<compile_context>
chip_gen: v7x
topology: tpu7x:2x2x1
jax: 0.10.0
libtpu: 0.0.40
codegen_flags: <defaults>
</compile_context>

<pallas_src>
import functools

import jax
import jax.numpy as jnp
from jax.experimental import pallas as pl
from jax.experimental.pallas import tpu as pltpu


def _skipgram_kernel(pu_ref, pv_ref, nv_ref,        # (bm,1),(bm,1),(bm,N) int32 tiles
                     u_w_ref, v_w_ref,              # (Ep,Dp) VMEM-resident tables
                     out_ref,                       # (1,1,128) f32 partial losses
                     *, block_b, n_neg, e_pad, batch):
    i = pl.program_id(0)
    row0 = i * block_b

    # Validity mask for the (possibly partial) last tile.  Padded rows carry
    # index 0 (a valid row), so the gather is safe; the mask zeroes their loss.
    row_ids = jax.lax.broadcasted_iota(jnp.int32, (block_b, 1), 0) + row0
    mask = (row_ids < batch).astype(jnp.float32)                       # (bm, 1)

    col = jax.lax.broadcasted_iota(jnp.int32, (block_b, e_pad), 1)     # (bm, Ep)
    tdtype = u_w_ref.dtype

    def gather(table_ref, idx):
        # idx: (bm, 1) int32 -> one-hot (bm, Ep) -> MXU matmul -> (bm, Dp) f32
        onehot = (col == idx).astype(tdtype)
        return jnp.dot(onehot, table_ref[...],
                       preferred_element_type=jnp.float32)

    # ---- positive term: -logsigmoid(clamp(<u, v>)) ----
    emb_u = gather(u_w_ref, pu_ref[...])                               # (bm, Dp) f32
    emb_v = gather(v_w_ref, pv_ref[...])                               # (bm, Dp) f32
    pos_score = jnp.clip(jnp.sum(emb_u * emb_v, axis=1, keepdims=True), -6.0, 6.0)
    pos_partial = jnp.sum(jnp.log(1.0 + jnp.exp(-pos_score)) * mask)   # -logsigmoid(x)

    # ---- negative term: sum_n -logsigmoid(-clamp(<u, v_neg_n>)) ----
    nv = nv_ref[...]                                                   # (bm, N) int32
    cols = []
    for n in range(n_neg):                                             # static, small N
        emb_n = gather(v_w_ref, nv[:, n:n + 1])                        # (bm, Dp) f32
        cols.append(jnp.sum(emb_u * emb_n, axis=1, keepdims=True))     # (bm, 1)
    neg_scores = jnp.clip(jnp.concatenate(cols, axis=1), -6.0, 6.0)    # (bm, N)
    neg_partial = jnp.sum(jnp.log(1.0 + jnp.exp(neg_scores)) * mask)   # -logsigmoid(-x)

    # Merged lane-dense output: pos loss in lane 0, neg loss in lane 1.
    lane = jax.lax.broadcasted_iota(jnp.int32, out_ref.shape, 2)
    out_ref[...] = jnp.where(lane == 0, pos_partial,
                             jnp.where(lane == 1, neg_partial, 0.0))


def skipgram_forward(u_weight, v_weight, pos_u, pos_v, neg_v, *,
                     block_b=256, table_dtype=jnp.float32):
    """Returns (sum(pos_loss), sum(neg_loss)) exactly like SkipGramModel.forward."""
    B = pos_u.shape[0]
    N = neg_v.shape[1]
    E, D = u_weight.shape

    def _round_up(x, m):
        return ((x + m - 1) // m) * m

    Dp = _round_up(D, 128)          # lane-dense embedding dim (zero pad: dot unchanged)
    Ep = _round_up(E, 8)            # sublane-aligned vocab (zero rows never selected)

    # Keep the tile a multiple of 8 sublanes and, when possible, >= 2 tiles so
    # the "parallel" batch axis can shard across TensorCores (megacore).
    block_b = max(8, min(_round_up(block_b, 8), _round_up(max((B + 1) // 2, 1), 8)))
    num_tiles = (B + block_b - 1) // block_b
    B_pad = num_tiles * block_b

    # ---- VMEM budget / limit (tables are single-buffered & resident) ----
    itemsize = jnp.dtype(table_dtype).itemsize
    table_bytes = 2 * Ep * Dp * itemsize
    onehot_bytes = block_b * Ep * max(itemsize, 4)
    act_bytes = 4 * block_b * Dp * 4
    idx_bytes = 4 * block_b * (N + 2) * 4          # double-buffered int32 index tiles
    need = table_bytes + onehot_bytes + act_bytes + idx_bytes + 4 * 128 * 4
    try:
        vmem_cap = pltpu.get_tpu_info().vmem_capacity_bytes
    except Exception:
        vmem_cap = 64 << 20
    if need > vmem_cap - (4 << 20):
        # TODO(synk): HBM-resident tables + manual double-buffered
        # pltpu.make_async_copy row gather for vocabularies too large for VMEM.
        raise NotImplementedError(
            f"Embedding tables + working set need ~{need >> 20} MiB VMEM but the "
            f"device has {vmem_cap >> 20} MiB; HBM-gather fallback not implemented.")
    vmem_limit = int(min(max(int(1.5 * need) + (4 << 20), 32 << 20), vmem_cap))

    # ---- pad / cast operands ----
    u_w = jnp.pad(u_weight.astype(table_dtype), ((0, Ep - E), (0, Dp - D)))
    v_w = jnp.pad(v_weight.astype(table_dtype), ((0, Ep - E), (0, Dp - D)))

    def pad_b(x):
        pad = [(0, B_pad - B)] + [(0, 0)] * (x.ndim - 1)
        return jnp.pad(x.astype(jnp.int32), pad)

    pos_u_p = pad_b(pos_u).reshape(B_pad, 1)
    pos_v_p = pad_b(pos_v).reshape(B_pad, 1)
    neg_v_p = pad_b(neg_v)                                             # (B_pad, N)

    kernel = functools.partial(_skipgram_kernel, block_b=block_b, n_neg=N,
                               e_pad=Ep, batch=B)

    out = pl.pallas_call(
        kernel,
        grid=(num_tiles,),
        in_specs=[
            pl.BlockSpec((block_b, 1), lambda i: (i, 0)),              # pos_u ids
            pl.BlockSpec((block_b, 1), lambda i: (i, 0)),              # pos_v ids
            pl.BlockSpec((block_b, N), lambda i: (i, 0)),              # neg_v ids
            # Whole tables, VMEM-resident, single-buffered (no pipelining).
            pl.BlockSpec(memory_space=pltpu.MemorySpace.VMEM),
            pl.BlockSpec(memory_space=pltpu.MemorySpace.VMEM),
        ],
        out_specs=pl.BlockSpec((1, 1, 128), lambda i: (i, 0, 0)),
        out_shape=jax.ShapeDtypeStruct((num_tiles, 1, 128), jnp.float32),
        compiler_params=pltpu.CompilerParams(
            dimension_semantics=("parallel",),
            vmem_limit_bytes=vmem_limit),
    )(pos_u_p, pos_v_p, neg_v_p, u_w, v_w)

    parts = jnp.sum(out[:, 0, :], axis=0)                              # (128,)
    return parts[0], parts[1]


if __name__ == "__main__":
    # Small, deterministic shapes consistent with the module.
    emb_size = 64        # number of nodes
    emb_dimension = 32   # embedding dim
    B = 13               # batch of positive pairs (not a tile multiple -> tail mask)
    N = 4                # negatives per positive

    key = jax.random.PRNGKey(0)
    k_u, k_v, k_pu, k_pv, k_nv = jax.random.split(key, 5)

    # Nonzero weights so the +/-6 clamp path is exercised (module zero-inits
    # v_embeddings, which would make the check trivial).  Weights are rounded
    # to the bf16 grid so the MXU one-hot gather is bit-exact regardless of
    # the matmul's internal operand precision.
    u_weight = jax.random.normal(k_u, (emb_size, emb_dimension), jnp.float32)
    v_weight = jax.random.normal(k_v, (emb_size, emb_dimension), jnp.float32)
    u_weight = u_weight.astype(jnp.bfloat16).astype(jnp.float32)
    v_weight = v_weight.astype(jnp.bfloat16).astype(jnp.float32)

    pos_u = jax.random.randint(k_pu, (B,), 0, emb_size, dtype=jnp.int32)
    pos_v = jax.random.randint(k_pv, (B,), 0, emb_size, dtype=jnp.int32)
    neg_v = jax.random.randint(k_nv, (B, N), 0, emb_size, dtype=jnp.int32)

    pos_loss, neg_loss = skipgram_forward(u_weight, v_weight, pos_u, pos_v, neg_v)
    jax.block_until_ready((pos_loss, neg_loss))

    # Pure-JAX reference (same math as the PyTorch forward, no Pallas).
    emb_u = u_weight[pos_u]
    emb_v = v_weight[pos_v]
    emb_nv = v_weight[neg_v]                                           # (B, N, D)
    pos_s = jnp.clip(jnp.sum(emb_u * emb_v, axis=1), -6.0, 6.0)
    ref_pos = jnp.sum(-jax.nn.log_sigmoid(pos_s))
    neg_s = jnp.clip(jnp.sum(emb_nv * emb_u[:, None, :], axis=-1), -6.0, 6.0)
    ref_neg = jnp.sum(-jax.nn.log_sigmoid(-neg_s))

    assert jnp.allclose(pos_loss, ref_pos, rtol=1e-4, atol=1e-3), (pos_loss, ref_pos)
    assert jnp.allclose(neg_loss, ref_neg, rtol=1e-4, atol=1e-3), (neg_loss, ref_neg)

    print("KERNEL_OK")
</pallas_src>

<mosaic_0001>
module attributes {stable_mosaic.version = 11 : i64} {
  func.func @_skipgram_kernel(%arg0: i32, %arg1: memref<8x1xi32, #tpu.memory_space<vmem>>, %arg2: memref<8x1xi32, #tpu.memory_space<vmem>>, %arg3: memref<8x4xi32, #tpu.memory_space<vmem>>, %arg4: memref<64x128xf32, #tpu.memory_space<vmem>>, %arg5: memref<64x128xf32, #tpu.memory_space<vmem>>, %arg6: memref<1x1x128xf32, #tpu.memory_space<vmem>>) attributes {dimension_semantics = [#tpu.dimension_semantics<parallel>], iteration_bounds = array<i64: 2>, scalar_prefetch = 0 : i64, scratch_operands = 0 : i64, tpu.core_type = #tpu.core_type<tc>, window_params = [{transform_indices = @transform_0, window_bounds = array<i64: 8, 1>}, {transform_indices = @transform_1, window_bounds = array<i64: 8, 1>}, {transform_indices = @transform_2, window_bounds = array<i64: 8, 4>}, {pipeline_mode = #tpu.pipeline_mode<synchronous>, transform_indices = @transform_3, window_bounds = array<i64: 64, 128>}, {pipeline_mode = #tpu.pipeline_mode<synchronous>, transform_indices = @transform_4, window_bounds = array<i64: 64, 128>}, {transform_indices = @transform_5, window_bounds = array<i64: 1, 1, 128>}]} {
    %c8_i32 = arith.constant 8 : i32
    %0 = arith.muli %arg0, %c8_i32 : i32
    %1 = tpu.iota {dimensions = array<i32: 0>} : vector<8x1xi32>
    %2 = vector.broadcast %0 : i32 to vector<8x1xi32>
    %3 = arith.addi %1, %2 : vector<8x1xi32>
    %c13_i32 = arith.constant 13 : i32
    %4 = vector.broadcast %c13_i32 : i32 to vector<8x1xi32>
    %5 = arith.cmpi slt, %3, %4 : vector<8x1xi32>
    %6 = arith.extui %5 : vector<8x1xi1> to vector<8x1xi32>
    %7 = arith.sitofp %6 : vector<8x1xi32> to vector<8x1xf32>
    %8 = tpu.iota {dimensions = array<i32: 1>} : vector<8x64xi32>
    %c0 = arith.constant 0 : index
    %c0_0 = arith.constant 0 : index
    %9 = vector.load %arg1[%c0, %c0_0] : memref<8x1xi32, #tpu.memory_space<vmem>>, vector<8x1xi32>
    %10 = vector.broadcast %9 : vector<8x1xi32> to vector<8x64xi32>
    %11 = arith.cmpi eq, %8, %10 : vector<8x64xi32>
    %12 = arith.extui %11 : vector<8x64xi1> to vector<8x64xi32>
    %13 = arith.sitofp %12 : vector<8x64xi32> to vector<8x64xf32>
    %c0_1 = arith.constant 0 : index
    %c0_2 = arith.constant 0 : index
    %14 = vector.load %arg4[%c0_1, %c0_2] : memref<64x128xf32, #tpu.memory_space<vmem>>, vector<64x128xf32>
    %cst = arith.constant dense<0.000000e+00> : vector<8x128xf32>
    %15 = tpu.matmul %13, %14, %cst {dimension_numbers = #tpu.dot_dimension_numbers<[1], [0], [0], [1], [0, 0, 1, 1], [], []>} : vector<8x64xf32>, vector<64x128xf32>, vector<8x128xf32> -> vector<8x128xf32>
    %c0_3 = arith.constant 0 : index
    %c0_4 = arith.constant 0 : index
    %16 = vector.load %arg2[%c0_3, %c0_4] : memref<8x1xi32, #tpu.memory_space<vmem>>, vector<8x1xi32>
    %17 = vector.broadcast %16 : vector<8x1xi32> to vector<8x64xi32>
    %18 = arith.cmpi eq, %8, %17 : vector<8x64xi32>
    %19 = arith.extui %18 : vector<8x64xi1> to vector<8x64xi32>
    %20 = arith.sitofp %19 : vector<8x64xi32> to vector<8x64xf32>
    %c0_5 = arith.constant 0 : index
    %c0_6 = arith.constant 0 : index
    %21 = vector.load %arg5[%c0_5, %c0_6] : memref<64x128xf32, #tpu.memory_space<vmem>>, vector<64x128xf32>
    %cst_7 = arith.constant dense<0.000000e+00> : vector<8x128xf32>
    %22 = tpu.matmul %20, %21, %cst_7 {dimension_numbers = #tpu.dot_dimension_numbers<[1], [0], [0], [1], [0, 0, 1, 1], [], []>} : vector<8x64xf32>, vector<64x128xf32>, vector<8x128xf32> -> vector<8x128xf32>
    %23 = arith.mulf %15, %22 : vector<8x128xf32>
    %cst_8 = arith.constant dense<0.000000e+00> : vector<8xf32>
    %24 = vector.multi_reduction <add>, %23, %cst_8 [1] : vector<8x128xf32> to vector<8xf32>
    %25 = vector.shape_cast %24 : vector<8xf32> to vector<8x1xf32>
    %cst_9 = arith.constant -6.000000e+00 : f32
    %cst_10 = arith.constant 6.000000e+00 : f32
    %26 = vector.broadcast %cst_9 : f32 to vector<8x1xf32>
    %27 = arith.maximumf %26, %25 : vector<8x1xf32>
    %28 = vector.broadcast %cst_10 : f32 to vector<8x1xf32>
    %29 = arith.minimumf %28, %27 : vector<8x1xf32>
    %cst_11 = arith.constant 0.000000e+00 : f32
    %30 = vector.broadcast %cst_11 : f32 to vector<8x1xf32>
    %31 = arith.subf %30, %29 : vector<8x1xf32>
    %32 = math.exp %31 : vector<8x1xf32>
    %cst_12 = arith.constant 1.000000e+00 : f32
    %33 = vector.broadcast %cst_12 : f32 to vector<8x1xf32>
    %34 = arith.addf %33, %32 : vector<8x1xf32>
    %35 = math.log %34 : vector<8x1xf32>
    %36 = arith.mulf %35, %7 : vector<8x1xf32>
    %37 = vector.shape_cast %36 : vector<8x1xf32> to vector<1x8x1xf32>
    %cst_13 = arith.constant dense<0.000000e+00> : vector<1xf32>
    %38 = vector.multi_reduction <add>, %37, %cst_13 [1, 2] : vector<1x8x1xf32> to vector<1xf32>
    %39 = vector.shape_cast %38 : vector<1xf32> to vector<1x1x1xf32>
    %40 = vector.extract %39[0, 0, 0] : f32 from vector<1x1x1xf32>
    %c0_14 = arith.constant 0 : index
    %c0_15 = arith.constant 0 : index
    %41 = vector.load %arg3[%c0_14, %c0_15] : memref<8x4xi32, #tpu.memory_space<vmem>>, vector<8x4xi32>
    %42 = vector.extract_strided_slice %41 {offsets = [0, 0], sizes = [8, 1], strides = [1, 1]} : vector<8x4xi32> to vector<8x1xi32>
    %43 = vector.broadcast %42 : vector<8x1xi32> to vector<8x64xi32>
    %44 = arith.cmpi eq, %8, %43 : vector<8x64xi32>
    %45 = arith.extui %44 : vector<8x64xi1> to vector<8x64xi32>
    %46 = arith.sitofp %45 : vector<8x64xi32> to vector<8x64xf32>
    %c0_16 = arith.constant 0 : index
    %c0_17 = arith.constant 0 : index
    %47 = vector.load %arg5[%c0_16, %c0_17] : memref<64x128xf32, #tpu.memory_space<vmem>>, vector<64x128xf32>
    %cst_18 = arith.constant dense<0.000000e+00> : vector<8x128xf32>
    %48 = tpu.matmul %46, %47, %cst_18 {dimension_numbers = #tpu.dot_dimension_numbers<[1], [0], [0], [1], [0, 0, 1, 1], [], []>} : vector<8x64xf32>, vector<64x128xf32>, vector<8x128xf32> -> vector<8x128xf32>
    %49 = arith.mulf %15, %48 : vector<8x128xf32>
    %cst_19 = arith.constant dense<0.000000e+00> : vector<8xf32>
    %50 = vector.multi_reduction <add>, %49, %cst_19 [1] : vector<8x128xf32> to vector<8xf32>
    %51 = vector.shape_cast %50 : vector<8xf32> to vector<8x1xf32>
    %52 = vector.extract_strided_slice %41 {offsets = [0, 1], sizes = [8, 1], strides = [1, 1]} : vector<8x4xi32> to vector<8x1xi32>
    %53 = vector.broadcast %52 : vector<8x1xi32> to vector<8x64xi32>
    %54 = arith.cmpi eq, %8, %53 : vector<8x64xi32>
    %55 = arith.extui %54 : vector<8x64xi1> to vector<8x64xi32>
    %56 = arith.sitofp %55 : vector<8x64xi32> to vector<8x64xf32>
    %c0_20 = arith.constant 0 : index
    %c0_21 = arith.constant 0 : index
    %57 = vector.load %arg5[%c0_20, %c0_21] : memref<64x128xf32, #tpu.memory_space<vmem>>, vector<64x128xf32>
    %cst_22 = arith.constant dense<0.000000e+00> : vector<8x128xf32>
    %58 = tpu.matmul %56, %57, %cst_22 {dimension_numbers = #tpu.dot_dimension_numbers<[1], [0], [0], [1], [0, 0, 1, 1], [], []>} : vector<8x64xf32>, vector<64x128xf32>, vector<8x128xf32> -> vector<8x128xf32>
    %59 = arith.mulf %15, %58 : vector<8x128xf32>
    %cst_23 = arith.constant dense<0.000000e+00> : vector<8xf32>
    %60 = vector.multi_reduction <add>, %59, %cst_23 [1] : vector<8x128xf32> to vector<8xf32>
    %61 = vector.shape_cast %60 : vector<8xf32> to vector<8x1xf32>
    %62 = vector.extract_strided_slice %41 {offsets = [0, 2], sizes = [8, 1], strides = [1, 1]} : vector<8x4xi32> to vector<8x1xi32>
    %63 = vector.broadcast %62 : vector<8x1xi32> to vector<8x64xi32>
    %64 = arith.cmpi eq, %8, %63 : vector<8x64xi32>
    %65 = arith.extui %64 : vector<8x64xi1> to vector<8x64xi32>
    %66 = arith.sitofp %65 : vector<8x64xi32> to vector<8x64xf32>
    %c0_24 = arith.constant 0 : index
    %c0_25 = arith.constant 0 : index
    %67 = vector.load %arg5[%c0_24, %c0_25] : memref<64x128xf32, #tpu.memory_space<vmem>>, vector<64x128xf32>
    %cst_26 = arith.constant dense<0.000000e+00> : vector<8x128xf32>
    %68 = tpu.matmul %66, %67, %cst_26 {dimension_numbers = #tpu.dot_dimension_numbers<[1], [0], [0], [1], [0, 0, 1, 1], [], []>} : vector<8x64xf32>, vector<64x128xf32>, vector<8x128xf32> -> vector<8x128xf32>
    %69 = arith.mulf %15, %68 : vector<8x128xf32>
    %cst_27 = arith.constant dense<0.000000e+00> : vector<8xf32>
    %70 = vector.multi_reduction <add>, %69, %cst_27 [1] : vector<8x128xf32> to vector<8xf32>
    %71 = vector.shape_cast %70 : vector<8xf32> to vector<8x1xf32>
    %72 = vector.extract_strided_slice %41 {offsets = [0, 3], sizes = [8, 1], strides = [1, 1]} : vector<8x4xi32> to vector<8x1xi32>
    %73 = vector.broadcast %72 : vector<8x1xi32> to vector<8x64xi32>
    %74 = arith.cmpi eq, %8, %73 : vector<8x64xi32>
    %75 = arith.extui %74 : vector<8x64xi1> to vector<8x64xi32>
    %76 = arith.sitofp %75 : vector<8x64xi32> to vector<8x64xf32>
    %c0_28 = arith.constant 0 : index
    %c0_29 = arith.constant 0 : index
    %77 = vector.load %arg5[%c0_28, %c0_29] : memref<64x128xf32, #tpu.memory_space<vmem>>, vector<64x128xf32>
    %cst_30 = arith.constant dense<0.000000e+00> : vector<8x128xf32>
    %78 = tpu.matmul %76, %77, %cst_30 {dimension_numbers = #tpu.dot_dimension_numbers<[1], [0], [0], [1], [0, 0, 1, 1], [], []>} : vector<8x64xf32>, vector<64x128xf32>, vector<8x128xf32> -> vector<8x128xf32>
    %79 = arith.mulf %15, %78 : vector<8x128xf32>
    %cst_31 = arith.constant dense<0.000000e+00> : vector<8xf32>
    %80 = vector.multi_reduction <add>, %79, %cst_31 [1] : vector<8x128xf32> to vector<8xf32>
    %81 = vector.shape_cast %80 : vector<8xf32> to vector<8x1xf32>
    %82 = tpu.concatenate %51, %61, %71, %81 in 1 : vector<8x1xf32>, vector<8x1xf32>, vector<8x1xf32>, vector<8x1xf32> -> vector<8x4xf32>
    %cst_32 = arith.constant -6.000000e+00 : f32
    %cst_33 = arith.constant 6.000000e+00 : f32
    %83 = vector.broadcast %cst_32 : f32 to vector<8x4xf32>
    %84 = arith.maximumf %83, %82 : vector<8x4xf32>
    %85 = vector.broadcast %cst_33 : f32 to vector<8x4xf32>
    %86 = arith.minimumf %85, %84 : vector<8x4xf32>
    %87 = math.exp %86 : vector<8x4xf32>
    %cst_34 = arith.constant 1.000000e+00 : f32
    %88 = vector.broadcast %cst_34 : f32 to vector<8x4xf32>
    %89 = arith.addf %88, %87 : vector<8x4xf32>
    %90 = math.log %89 : vector<8x4xf32>
    %91 = vector.broadcast %7 : vector<8x1xf32> to vector<8x4xf32>
    %92 = arith.mulf %90, %91 : vector<8x4xf32>
    %93 = vector.shape_cast %92 : vector<8x4xf32> to vector<1x8x4xf32>
    %cst_35 = arith.constant dense<0.000000e+00> : vector<1xf32>
    %94 = vector.multi_reduction <add>, %93, %cst_35 [1, 2] : vector<1x8x4xf32> to vector<1xf32>
    %95 = vector.shape_cast %94 : vector<1xf32> to vector<1x1x1xf32>
    %96 = vector.extract %95[0, 0, 0] : f32 from vector<1x1x1xf32>
    %97 = tpu.iota {dimensions = array<i32: 2>} : vector<1x1x128xi32>
    %c0_i32 = arith.constant 0 : i32
    %98 = vector.broadcast %c0_i32 : i32 to vector<1x1x128xi32>
    %99 = arith.cmpi eq, %97, %98 : vector<1x1x128xi32>
    %c1_i32 = arith.constant 1 : i32
    %100 = vector.broadcast %c1_i32 : i32 to vector<1x1x128xi32>
    %101 = arith.cmpi eq, %97, %100 : vector<1x1x128xi32>
    %cst_36 = arith.constant 0.000000e+00 : f32
    %102 = vector.broadcast %96 : f32 to vector<1x1x128xf32>
    %103 = vector.broadcast %cst_36 : f32 to vector<1x1x128xf32>
    %104 = arith.select %101, %102, %103 : vector<1x1x128xi1>, vector<1x1x128xf32>
    %105 = vector.broadcast %40 : f32 to vector<1x1x128xf32>
    %106 = arith.select %99, %105, %104 : vector<1x1x128xi1>, vector<1x1x128xf32>
    %c0_37 = arith.constant 0 : index
    %c0_38 = arith.constant 0 : index
    %c0_39 = arith.constant 0 : index
    %107 = vector.load %arg6[%c0_37, %c0_38, %c0_39] : memref<1x1x128xf32, #tpu.memory_space<vmem>>, vector<1x1x128xf32>
    tpu.vector_store %arg6[%c0_37, %c0_38, %c0_39], %106 {strides = array<i32>} : memref<1x1x128xf32, #tpu.memory_space<vmem>>, vector<1x1x128xf32>,
    return
  }
  func.func @transform_0(%arg0: i32) -> (i32, i32) {
    %c0_i32 = arith.constant 0 : i32
    %c0_i32_0 = arith.constant 0 : i32
    return %arg0, %c0_i32 : i32, i32
  }
  func.func @transform_1(%arg0: i32) -> (i32, i32) {
    %c0_i32 = arith.constant 0 : i32
    %c0_i32_0 = arith.constant 0 : i32
    return %arg0, %c0_i32 : i32, i32
  }
  func.func @transform_2(%arg0: i32) -> (i32, i32) {
    %c0_i32 = arith.constant 0 : i32
    %c0_i32_0 = arith.constant 0 : i32
    return %arg0, %c0_i32 : i32, i32
  }
  func.func @transform_3(%arg0: i32) -> (i32, i32) {
    %c0_i32 = arith.constant 0 : i32
    %c0_i32_0 = arith.constant 0 : i32
    %c0_i32_1 = arith.constant 0 : i32
    return %c0_i32, %c0_i32_0 : i32, i32
  }
  func.func @transform_4(%arg0: i32) -> (i32, i32) {
    %c0_i32 = arith.constant 0 : i32
    %c0_i32_0 = arith.constant 0 : i32
    %c0_i32_1 = arith.constant 0 : i32
    return %c0_i32, %c0_i32_0 : i32, i32
  }
  func.func @transform_5(%arg0: i32) -> (i32, i32, i32) {
    %c0_i32 = arith.constant 0 : i32
    %c0_i32_0 = arith.constant 0 : i32
    %c0_i32_1 = arith.constant 0 : i32
    return %arg0, %c0_i32, %c0_i32_0 : i32, i32, i32
  }
}

</mosaic_0001>

<bundles_post_ra>
// kernel: tpu_custom_call.1
= control target key start
LH: loop header
LB: loop body
LE: loop exit
PB: predicated region body
PF: predicated region fallthrough
CT: control target
= control target key end

     0   :  { %10 = vsyncpa [#allocation3], 0  ;;  %s1679_s0 = inlined_call_operand.vmem [shape: s32[16,1], index: 0, kind: input, shape index: {}]   ;;  %s1680_s1 = inlined_call_operand.vmem [shape: s32[16,1], index: 1, kind: input, shape index: {}]   ;;  %s1681_s2 = inlined_call_operand.vmem [shape: s32[16,4], index: 2, kind: input, shape index: {}]   ;;  %s1682_s3 = inlined_call_operand.vmem [shape: f32[64,128], index: 3, kind: input, shape index: {}]   ;;  %s1683_s4 = inlined_call_operand.hbm [shape: f32[64,128], index: 4, kind: input, shape index: {}]   ;;  %s1684_s5 = inlined_call_operand.hbm [shape: f32[2,1,128], index: 5, kind: output, shape index: {}]  }
   0x1   :  { %11 = vsyncpa [#allocation4], 0 }
   0x2   :  { %13 = vsyncpa [#allocation4 + $0x1], 0  ;;  %s1424_s18 = smov 0   ;;  %s1426_s19 = smov 0  }
   0x3   :  { %s1428_s20 = smov 0   ;;  %s1430_s21 = smov 0  }
   0x4 LB: > { %s1445_s22 = sadd.s32 4294967295, %s1381_s21   ;;  %s942_s23 = sadd.s32 4294967294, %s1381_s21   ;;  %s1381_s21 = sphi %s1430_s21, %s1700_s21   ;;  %s1377_s20 = sphi %s1428_s20, %s1699_s20   ;;  %s1373_s19 = sphi %s1426_s19, %s1698_s19   ;;  %s1369_s18 = sphi %s1424_s18, %s1697_s18  }
   0x5   : > { %s1449_s24 = sadd.s32 1, %s1381_s21   ;;  %s146_s25 = sadd.s32 1, %s1377_s20 }
   0x6   : > { %s143_s26 = ssub.s32 %s1381_s21, %s1449_s24  ;;  %p156_p0 = scmp.ne.s32.totalorder %s1377_s20, %s1373_s19 }
   0x7   : > { %p144_p1 = scmp.eq.s32.totalorder %s143_s26, 0  ;;  %p157_p2 = scmp.eq.s32.totalorder %s1445_s22, 1 }
   0x8   : > { %p162_p3 = scmp.ne.s32.totalorder %s1373_s19, %s1369_s18  ;;  %p163_p4 = scmp.eq.s32.totalorder %s942_s23, 1 }
   0x9   : > { %s1460_s27 = scalar_select %p144_p1, %s1377_s20, %s146_s25  }
   0xa   : > { %p1462_p5 = por %p157_p2, %p156_p0  ;;  %p1466_p6 = por %p163_p4, %p162_p3 }
   0xb   : > { %p943_p7 = scmp.ge.s32.totalorder %s1381_s21, 1  ;;  %p170_p8 = scmp.lt.s32.totalorder %s1381_s21, 3 }
   0xc   : > { %s1688_s28 = scalar_select %p1462_p5, 1, 0 }
   0xd   : > { %s1689_s29 = scalar_select %p1466_p6, 1, 0 }
   0xe   : > { %p1685_p9 = scmp.eq.s32.totalorder %s1445_s22, 0  ;;  %p1473_p10 = pnand %p943_p7, %p170_p8 }
   0xf   : > { %s1383_s6 = smov [#allocation2]   ;;  %s1287_s11 = scalar_lea.hbm %s1683_s4, 1024 }
  0x10   : > { %s1690_s30 = scalar_select %p1473_p10, 1, 0 }
  0x11   : > { %s185_s7 = sshll.u32 %s1383_s6, 4  ;;  %p1220_p11 = pneg %p1473_p10  ;;  %s186_s7 = int_to_ptr.vmem [resolvable:$true] %s185_s7 }
  0x12   : > { %p1288_p13 = scmp.ne.s32.totalorder %s1683_s4, %s1287_s11  ;;  %p1294_p3 = scmp.lt.u32.totalorder %s1287_s11, %s1683_s4 }
  0x13   : > { %p1481_p12 = pnand %p1685_p9, %p1220_p11 }
  0x15   : > { %p1289_p0 = pneg %p1481_p12 }
  0x17   : > { %p1290_p1 = pnand %p1289_p0, %p1288_p13 }
  0x19   : > { %p1291_p2 = pneg %p1290_p1 }
  0x1b   : > { %p1296_p4 = pnand %p1294_p3, %p1291_p2 }
  0x1d   : > { %1299 = shalt.err (!%p1296_p4)
}
  0x1e   : > { %s1300_s16 = scalar_lea.vmem %s186_s7, 1024  ;;  %p1308_p9 = scmp.lt.s32.totalorder %s186_s7, %s186_s7 }
  0x1f   : > { %p1301_p7 = scmp.ne.s32.totalorder %s186_s7, %s1300_s16  ;;  %p1309_p6 = scmp.lt.s32.totalorder %s1300_s16, %s1300_s16 }
  0x21   : > { %p1303_p8 = pnand %p1301_p7, %p1289_p0  ;;  %p1310_p5 = por %p1309_p6, %p1308_p9 }
  0x23   : > { %p1304_p11 = pneg %p1303_p8 }
  0x25   : > { %p1311_p10 = pnand %p1310_p5, %p1304_p11 }
  0x27   : > { %1314 = shalt.err (!%p1311_p10)
}
  0x28   : > { %s1384_s17 = smov 128   ;;  %s1385_s23 = smov 8  }
  0x29   : > { %1223 = dma.hbm_to_vmem [thread:$0]  (!%p1481_p12), %s1683_s4, 1024, %s186_s7, [#allocation3], %s1384_s17, %s1384_s17, %s1385_s23  }
  0x2a   : > { %p1692_p13 = scmp.ne.s32.totalorder %s1690_s30, 0 }
  0x2b   : > { %p1693_p1 = scmp.eq.s32.totalorder (!%p1692_p13), %s1445_s22, 0 }
  0x2c   : > { %222 = sbr.rel (%p1692_p13) target bundleno = 836 (0x344), region = 40 }
  0x33   : > { %1360 = dma.done.wait (%p1693_p1), [#allocation3], 1024   ;;  %p1694_p0 = pmov %p1693_p1 }
  0x34   : > { %p256_p5 = scmp.lt.s32.totalorder %s1445_s22, 1  ;;  %v1386_v0 = vmov 0   ;;  %v1387_v1 = vmov 0.0|0.0   ;;  %v285_v5 = vld [vmem:[%s1682_s3] sm:$0xff]  ;;  %v286_v6 = vld [vmem:[%s1682_s3 + $0x8] sm:$0xff]  ;;  %v287_v7 = vld [vmem:[%s1682_s3 + $0x10] sm:$0xff]  ;;  %v269_v33 = vlaneseq }
  0x35   : > { %1362 = vsyncadd (%p1694_p0), [#allocation3], 4294966272  ;;  %1273 = vset.pattern.permute.xlu0 %v1386_v0  ;;  %1274 = vset.pattern.permute.xlu1 %v1386_v0  ;;  %v1139_v8 = vpack.c.bf16 %v286_v6, %v285_v5  ;;  %v288_v9 = vld [vmem:[%s1682_s3 + $0x18] sm:$0xff]  ;;  %v374_v10 = vld [vmem:[#allocation2] sm:$0xff]  ;;  %vm1388_vm0 = vmmov 0   ;;  %v1389_v12 = vmov 0.0  }
  0x36   : > { %s257_s6 = scalar_select %p256_p5, %s1445_s22, 1  ;;  %1138 = vmatprep.subr.bf16.mxu0 %v1387_v1  ;;  %1150 = vmatprep.subr.bf16.mxu1 %v1387_v1  ;;  %v375_v11 = vld [vmem:[#allocation2 + $0x8] sm:$0xff]  ;;  %v1142_v14 = vpack.c.bf16 %v288_v9, %v287_v7  ;;  %v376_v15 = vld [vmem:[#allocation2 + $0x10] sm:$0xff]  ;;  %v377_v16 = vld [vmem:[#allocation2 + $0x18] sm:$0xff]  ;;  %v1390_v17 = vmov 1   ;;  %v1391_v24 = vmov 2  }
  0x37   : > { %1040 = vmatprep.mubr.msk.f32.mxu0 %vm1388_vm0, %v1389_v12  ;;  %1059 = vmatprep.mubr.msk.f32.mxu1 %vm1388_vm0, %v1389_v12  ;;  %v1536_v13 = vpack.c.bf16 %v375_v11, %v374_v10  ;;  %v289_v18 = vld [vmem:[%s1682_s3 + $0x20] sm:$0xff]  ;;  %v290_v19 = vld [vmem:[%s1682_s3 + $0x28] sm:$0xff]  ;;  %v1546_v20 = vpack.c.bf16 %v377_v16, %v376_v15  ;;  %v291_v25 = vld [vmem:[%s1682_s3 + $0x30] sm:$0xff]  ;;  %v1392_v27 = vmov 3   ;;  %v1569_v34 = vand.u32 127, %v269_v33  ;;  %s951_s16 = sshll.u32 %s1445_s22, 3 }
  0x38   : > { %s948_s30 = sshll.u32 %s257_s6, 3  ;;  %1140 = vmatpush3.bf16.msra.mxu0 %v1139_v8  ;;  %v1145_v21 = vpack.c.bf16 %v290_v19, %v289_v18  ;;  %v378_v22 = vld [vmem:[#allocation2 + $0x20] sm:$0xff]  ;;  %v379_v23 = vld [vmem:[#allocation2 + $0x28] sm:$0xff]  ;;  %v292_v26 = vld [vmem:[%s1682_s3 + $0x38] sm:$0xff]  ;;  %vm293_vm1 = vcmask 523264   ;;  %v270_v6 = vshrl.u32 %v269_v33, 7  ;;  %v271_v7 = vstv %s951_s16 }
  0x39   : > { %s259_s9 = scalar_lea.vmem %s1679_s0, %s948_s30  ;;  %s263_s12 = scalar_lea.vmem %s1680_s1, %s948_s30  ;;  %1141 = vmatprep.subr.bf16.mxu0 %v1387_v1  ;;  %1152 = vmatpush3.bf16.msra.mxu1 %v1536_v13  ;;  %v1557_v28 = vpack.c.bf16 %v379_v23, %v378_v22  ;;  %v1148_v29 = vpack.c.bf16 %v292_v26, %v291_v25  ;;  %v380_v30 = vld [vmem:[#allocation2 + $0x30] sm:$0xff]  ;;  %v381_v31 = vld [vmem:[#allocation2 + $0x38] sm:$0xff]  ;;  %vm467_vm9 = vcmask 7168   ;;  %vm808_vm10 = vcmask 15360  }
  0x3a   : > { %s267_s15 = scalar_lea.vmem %s1681_s2, %s948_s30  ;;  %v278_v2 = vld [vmem:[%s259_s9] sm:$0xff]  ;;  %1153 = vmatprep.subr.bf16.mxu1 %v1387_v1  ;;  %v1562_v32 = vpack.c.bf16 %v381_v31, %v380_v30  ;;  %v272_v8 = vadd.s32 %v271_v7, %v270_v6  ;;  %vm810_vm11 = vcmask 23552   ;;  %vm820_vm12 = vcmask 31744   ;;  %s254_s17 = sand.u32 1, %s1373_s19  }
  0x3b   : > { %v367_v3 = vld [vmem:[%s263_s12] sm:$0xff]  ;;  %280 = vperm.xlu0 %1273, %v278_v2   ;;  %s967_s23 = sshll.u32 %s1445_s22, 4  ;;  %vm832_vm13 = vcmp.eq.s32.totalorder %v1569_v34, 1  ;;  %s255_s26 = scalar_lea.vmem [#allocation5], %s254_s17  ;;  %vm831_vm14 = vcmp.eq.s32.totalorder %v1569_v34, 0 }
  0x3c   : > { %v478_v4 = vld [vmem:[%s267_s15] sm:$0xff]  ;;  %1143 = vmatpush3.bf16.msra.mxu0 %v1142_v14  ;;  %vm273_vm8 = vcmp.lt.s32.totalorder %v272_v8, 13  ;;  %s851_s6 = sshll.u32 %s255_s26, 4  ;;  %s1637_s9 = scalar_lea.hbm %s1684_s5, %s967_s23  ;;  %s1639_s6 = int_to_ptr.vmem [resolvable:$true] %s851_s6 }
  0x3d   : > { %480 = vperm.xlu1 %1274, %v478_v4   ;;  %1144 = vmatprep.subr.bf16.mxu0 %v1387_v1  ;;  %v952_v14 = vsel %vm273_vm8, 1.0, %v1389_v12  ;;  %s839_s22 = scalar_lea.sflag [#allocation4], %s254_s17  ;;  %s1315_s10 = scalar_lea.vmem %s1639_s6, 16 }
  0x3e   : > { %1155 = vmatpush3.bf16.msra.mxu1 %v1546_v20  ;;  %p1316_p6 = scmp.ne.s32.totalorder %s1639_s6, %s1315_s10  ;;  %p1695_p9 = scmp.ne.s32.totalorder %s1688_s28, 0 }
  0x3f   : > { %369 = vperm.xlu0 %1273, %v367_v3   ;;  %1156 = vmatprep.subr.bf16.mxu1 %v1387_v1  ;;  %s1393_s11 = smov [#allocation5]  }
  0x40   : > { %1146 = vmatpush3.bf16.msra.mxu0 %v1145_v21  ;;  %p1317_p10 = pnand %p1316_p6, %p1695_p9  ;;  %s1319_s12 = sshll.u32 %s1393_s11, 4  ;;  %s1320_s12 = int_to_ptr.vmem [resolvable:$false] %s1319_s12 }
  0x41   : > { %1275 = vset.pattern.permute.xlu1 %v1390_v17  ;;  %1147 = vmatprep.subr.bf16.mxu0 %v1387_v1  ;;  %s1321_s13 = scalar_lea.vmem %s1320_s12, 32  ;;  %p1322_p2 = scmp.lt.s32.totalorder %s1639_s6, %s1320_s12 }
  0x42   : > { %562 = vperm.xlu1 %1275, %v478_v4   ;;  %1158 = vmatpush3.bf16.msra.mxu1 %v1557_v28  ;;  %p1318_p12 = pneg %p1317_p10  ;;  %p1323_p3 = scmp.lt.s32.totalorder %s1321_s13, %s1315_s10 }
  0x43   : > { %1276 = vset.pattern.permute.xlu0 %v1391_v24  ;;  %1159 = vmatprep.subr.bf16.mxu1 %v1387_v1 }
  0x44   : > { %644 = vperm.xlu0 %1276, %v478_v4   ;;  %1149 = vmatpush3.bf16.msra.mxu0 %v1148_v29  ;;  %p1324_p4 = por %p1323_p3, %p1322_p2 }
  0x45   : > { %1162 = vmatprep.subr.bf16.mxu0 %v1387_v1 }
  0x46   : > { %1277 = vset.pattern.permute.xlu1 %v1392_v27  ;;  %1161 = vmatpush3.bf16.msra.mxu1 %v1562_v32  ;;  %p1325_p7 = pnand %p1324_p4, %p1318_p12 }
  0x47   : > { %726 = vperm.xlu1 %1277, %v478_v4   ;;  %1174 = vmatprep.subr.bf16.mxu1 %v1387_v1 }
  0x48   : > { %1278 = vset.pattern.permute.xlu0 %v1392_v27 }
  0xba   : > { %v281_v35 = vpop.permute.xlu0 %280 }
  0xbb   : > { %vm282_vm2 = vcmp.eq.s32.totalorder %v1569_v34, %v281_v35 }
  0xbc   : > { %v953_v36 = vsel %vm282_vm2, 1.0, %v1389_v12  ;;  %v481_v39 = vpop.permute.xlu1 %480 }
  0xbd   : > { %1041 = vmatmul.mubr.msk.f32.vlgmr.msra.gmra.mrb[0].mxu0 %vm293_vm1, %v953_v36  ;;  %vm482_vm4 = vcmp.eq.s32.totalorder %v1569_v34, %v481_v39 }
  0xbe   : > { %1164 = vmatpush3.bf16.msra.mxu0 %v1536_v13  ;;  %v370_v37 = vpop.permute.xlu0 %369  ;;  %1078 = vmatprep.mubr.msk.f32.mxu0 %vm1388_vm0, %v1389_v12  ;;  %v958_v41 = vsel %vm482_vm4, 1.0, %v1389_v12 }
  0xbf   : > { %vm371_vm3 = vcmp.eq.s32.totalorder %v1569_v34, %v370_v37  ;;  %1165 = vmatprep.subr.bf16.mxu0 %v1387_v1 }
  0xc0   : > { %v955_v38 = vsel %vm371_vm3, 1.0, %v1389_v12 }
  0xc1   : > { %1060 = vmatmul.mubr.msk.f32.vlgmr.msra.gmra.mrb[0].mxu1 %vm293_vm1, %v955_v38  ;;  %v563_v40 = vpop.permute.xlu1 %562 }
  0xc2   : > { %1167 = vmatpush3.bf16.msra.mxu0 %v1546_v20  ;;  %1176 = vmatpush3.bf16.msra.mxu1 %v1536_v13  ;;  %vm564_vm5 = vcmp.eq.s32.totalorder %v1569_v34, %v563_v40 }
  0xc3   : > { %1168 = vmatprep.subr.bf16.mxu0 %v1387_v1  ;;  %1177 = vmatprep.subr.bf16.mxu1 %v1387_v1  ;;  %v960_v42 = vsel %vm564_vm5, 1.0, %v1389_v12  ;;  %v645_v43 = vpop.permute.xlu0 %644 }
  0xc4   : > { %1097 = vmatprep.mubr.msk.f32.mxu1 %vm1388_vm0, %v1389_v12  ;;  %vm646_vm6 = vcmp.eq.s32.totalorder %v1569_v34, %v645_v43 }
  0xc5   : > { %v962_v45 = vsel %vm646_vm6, 1.0, %v1389_v12 }
  0xc6   : > { %1170 = vmatpush3.bf16.msra.mxu0 %v1557_v28  ;;  %1179 = vmatpush3.bf16.msra.mxu1 %v1546_v20  ;;  %v727_v44 = vpop.permute.xlu1 %726 }
  0xc7   : > { %1171 = vmatprep.subr.bf16.mxu0 %v1387_v1  ;;  %1180 = vmatprep.subr.bf16.mxu1 %v1387_v1  ;;  %vm728_vm7 = vcmp.eq.s32.totalorder %v1569_v34, %v727_v44 }
  0xc8   : > { %v964_v46 = vsel %vm728_vm7, 1.0, %v1389_v12 }
  0xca   : > { %1173 = vmatpush3.bf16.msra.mxu0 %v1562_v32  ;;  %1182 = vmatpush3.bf16.msra.mxu1 %v1557_v28 }
  0xcb   : > { %1183 = vmatprep.subr.bf16.mxu1 %v1387_v1  ;;  %1186 = vmatprep.subr.bf16.mxu0 %v1387_v1 }
  0xcd   : > { %1079 = vmatmul.mubr.msk.f32.vlgmr.msra.gmra.mrb[2].mxu0 %vm293_vm1, %v958_v41 }
  0xce   : > { %1185 = vmatpush3.bf16.msra.mxu1 %v1562_v32  ;;  %1188 = vmatpush3.bf16.msra.mxu0 %v1536_v13 }
  0xcf   : > { %1189 = vmatprep.subr.bf16.mxu0 %v1387_v1  ;;  %1198 = vmatprep.subr.bf16.mxu1 %v1387_v1 }
  0xd0   : > { %1116 = vmatprep.mubr.msk.f32.mxu0 %vm1388_vm0, %v1389_v12 }
  0xd1   : > { %1098 = vmatmul.mubr.msk.f32.vlgmr.msra.gmra.mrb[2].mxu1 %vm293_vm1, %v960_v42 }
  0xd2   : > { %1191 = vmatpush3.bf16.msra.mxu0 %v1546_v20  ;;  %1200 = vmatpush3.bf16.msra.mxu1 %v1536_v13 }
  0xd3   : > { %1192 = vmatprep.subr.bf16.mxu0 %v1387_v1  ;;  %1201 = vmatprep.subr.bf16.mxu1 %v1387_v1 }
  0xd4   : > { %1135 = vmatprep.mubr.msk.f32.mxu1 %vm1388_vm0, %v1389_v12 }
  0xd6   : > { %1194 = vmatpush3.bf16.msra.mxu0 %v1557_v28  ;;  %1203 = vmatpush3.bf16.msra.mxu1 %v1546_v20 }
  0xd7   : > { %1195 = vmatprep.subr.bf16.mxu0 %v1387_v1  ;;  %1204 = vmatprep.subr.bf16.mxu1 %v1387_v1 }
  0xda   : > { %1197 = vmatpush3.bf16.msra.mxu0 %v1562_v32  ;;  %1206 = vmatpush3.bf16.msra.mxu1 %v1557_v28 }
  0xdb   : > { %1207 = vmatprep.subr.bf16.mxu1 %v1387_v1 }
  0xdd   : > { %1117 = vmatmul.mubr.msk.f32.vlgmr.msra.gmra.mrb[4].mxu0 %vm293_vm1, %v962_v45 }
  0xde   : > { %1209 = vmatpush3.bf16.msra.mxu1 %v1562_v32 }
  0xe1   : > { %1136 = vmatmul.mubr.msk.f32.vlgmr.msra.gmra.mrb[4].mxu1 %vm293_vm1, %v964_v46 }
 0x190   : > { %v363_v47 = vpop.f32.mrb[0].mxu0 }
 0x191   : > { %v1042_v48 = vpop.f32.mrb[1].mxu0 }
 0x194   : > { %v451_v49 = vpop.f32.mrb[0].mxu1 }
 0x195   : > { %v455_v50 = vmul.f32 %v451_v49, %v363_v47  ;;  %v1061_v51 = vpop.f32.mrb[1].mxu1 }
 0x197   : > { %456 = vadd.xlane.f32.xlu0 %v455_v50 }
 0x1a0   : > { %v554_v52 = vpop.f32.mrb[2].mxu0 }
 0x1a1   : > { %v558_v53 = vmul.f32 %v554_v52, %v363_v47  ;;  %v1080_v54 = vpop.f32.mrb[3].mxu0 }
 0x1a3   : > { %559 = vadd.xlane.f32.xlu1 %v558_v53 }
 0x1a4   : > { %v636_v55 = vpop.f32.mrb[2].mxu1 }
 0x1a5   : > { %v640_v56 = vmul.f32 %v636_v55, %v363_v47  ;;  %v1099_v57 = vpop.f32.mrb[3].mxu1 }
 0x1a7   : > { %641 = vadd.xlane.f32.xlu0 %v640_v56 }
 0x1b0   : > { %v718_v58 = vpop.f32.mrb[4].mxu0 }
 0x1b1   : > { %v722_v59 = vmul.f32 %v718_v58, %v363_v47  ;;  %v1118_v60 = vpop.f32.mrb[5].mxu0 }
 0x1b3   : > { %723 = vadd.xlane.f32.xlu1 %v722_v59 }
 0x1b4   : > { %v800_v61 = vpop.f32.mrb[4].mxu1 }
 0x1b5   : > { %v804_v62 = vmul.f32 %v800_v61, %v363_v47  ;;  %v1137_v63 = vpop.f32.mrb[5].mxu1 }
 0x1b7   : > { %805 = vadd.xlane.f32.xlu0 %v804_v62 }
 0x224   : > { %v457_v0 = vpop.xlane.xlu0 %456 }
 0x225   : > { %v957_v1 = vclamps-f32 %v457_v0, 6.0 }
 0x227   : > { %v460_v2 = vsub.f32 0.0, %v957_v1 }
 0x229   : > { %v461_v3 = vmul.f32 1.442695, %v460_v2 }
 0x22b   : > { %1279 = vpow2.f32 %v461_v3 }
 0x230   : > { %v560_v9 = vpop.xlane.xlu1 %559 }
 0x234   : > { %v642_v10 = vpop.xlane.xlu0 %641 }
 0x235   : > { %v1280_v4 = vpop.eup %1279  ;;  %v807_v16 = vsel %vm467_vm9, %v560_v9, %v642_v10 }
 0x236   : > { %v463_v5 = vadd.f32 1.0, %v1280_v4 }
 0x238   : > { %1281 = vlog2.f32 %v463_v5 }
 0x240   : > { %v724_v11 = vpop.xlane.xlu1 %723 }
 0x241   : > { %v809_v18 = vsel %vm808_vm10, %v807_v16, %v724_v11 }
 0x242   : > { %v1282_v13 = vpop.eup %1281 }
 0x243   : > { %v465_v15 = vmul.f32 0.6931472, %v1282_v13 }
 0x244   : > { %v806_v17 = vpop.xlane.xlu0 %805 }
 0x245   : > { %v466_v19 = vmul.f32 %v952_v14, %v465_v15  ;;  %v811_v20 = vsel %vm810_vm11, %v809_v18, %v806_v17 }
 0x246   : > { %v966_v21 = vclamps-f32 %v811_v20, 6.0 }
 0x247   : > { %v468_v22 = vsel %vm467_vm9, %v466_v19, 0.0 }
 0x248   : > { %469 = vadd.xlane.f32.xlu1 %v468_v22  ;;  %v814_v23 = vmul.f32 1.442695, %v966_v21 }
 0x24a   : > { %1283 = vpow2.f32 %v814_v23 }
 0x254   : > { %v1284_v24 = vpop.eup %1283 }
 0x255   : > { %v816_v25 = vadd.f32 1.0, %v1284_v24 }
 0x257   : > { %1285 = vlog2.f32 %v816_v25 }
 0x261   : > { %v1286_v26 = vpop.eup %1285 }
 0x262   : > { %v818_v27 = vmul.f32 0.6931472, %v1286_v26 }
 0x264   : > { %v819_v28 = vmul.f32 %v952_v14, %v818_v27 }
 0x266   : > { %v821_v12 = vsel %vm820_vm12, %v819_v28, 0.0 }
 0x267   : > { %822 = vadd.xlane.f32.xlu0 %v821_v12 }
 0x2d5   : > { %v470_v29 = vpop.xlane.xlu1 %469 }
 0x2d6   : > { %v471_v30 = vrot.slane %v470_v29, 4 }
 0x2d8   : > { %v472_v31 = vadd.f32 %v471_v30, %v470_v29 }
 0x2da   : > { %v473_v32 = vrot.slane %v472_v31, 2 }
 0x2dc   : > { %v474_v33 = vadd.f32 %v473_v32, %v472_v31 }
 0x2de   : > { %v475_v35 = vrot.slane %v474_v33, 1 }
 0x2e0   : > { %v476_v36 = vadd.f32 %v475_v35, %v474_v33 }
 0x2e2   : > { %1210 = vpush %v476_v36 }
 0x2f4   : > { %v823_v37 = vpop.xlane.xlu0 %822 }
 0x2f5   : > { %v824_v38 = vrot.slane %v823_v37, 4 }
 0x2f7   : > { %v825_v39 = vadd.f32 %v824_v38, %v823_v37 }
 0x2f9   : > { %v826_v40 = vrot.slane %v825_v39, 2 }
 0x2fb   : > { %v827_v41 = vadd.f32 %v826_v40, %v825_v39 }
 0x2fd   : > { %v828_v42 = vrot.slane %v827_v41, 1 }
 0x2ff   : > { %v829_v43 = vadd.f32 %v828_v42, %v827_v41 }
 0x301   : > { %1212 = vpush %v829_v43 }
 0x313   : > { %s1211_s25 = spop %1210 }
 0x314   : > { %v835_v45 = vstv %s1211_s25 }
 0x332   : > { %s1213_s7 = spop %1212 }
 0x333   : > { %v833_v44 = vstv %s1213_s7 }
 0x334   : > { %v834_v46 = vsel %vm832_vm13, %v833_v44, 0.0 }
 0x335   : > { %v836_v47 = vsel %vm831_vm14, %v835_v45, %v834_v46 }
 0x336   : > { %837 = vst [vmem:[%s255_s26] sm:$0x1] %v836_v47 }
 0x337   : > { %1328 = shalt.err (!%p1325_p7)
}
 0x338   : > { %s1329_s14 = scalar_lea.hbm %s1637_s9, 16  ;;  %s1333_s17 = scalar_lea.hbm %s1684_s5, 32 }
 0x339   : > { %p1330_p8 = scmp.ne.s32.totalorder %s1637_s9, %s1329_s14  ;;  %p1334_p1 = scmp.lt.u32.totalorder %s1637_s9, %s1684_s5 }
 0x33a   : > { %p1335_p0 = scmp.lt.u32.totalorder %s1333_s17, %s1329_s14  ;;  %p1337_p6 = scmp.lt.u32.totalorder %s1329_s14, %s1637_s9 }
 0x33b   : > { %p1331_p11 = pnand %p1330_p8, %p1695_p9 }
 0x33c   : > { %p1336_p5 = por %p1335_p0, %p1334_p1 }
 0x33d   : > { %p1332_p13 = pneg %p1331_p11 }
 0x33e   : > { %p1338_p10 = por %p1337_p6, %p1336_p5 }
 0x340   : > { %p1339_p12 = pnand %p1338_p10, %p1332_p13 }
 0x342   : > { %1342 = shalt.err (!%p1339_p12)
}
 0x343   : > { %1218 = dma.vmem_to_hbm [thread:$0]  (%p1695_p9), %s1639_s6, 16, %s1637_s9, %s839_s22  }
 0x344 PF: > { %p1230_p2 = scmp.ge.s32.totalorder %s1381_s21, 2  ;;  %s863_s26 = sand.u32 1, %s1369_s18  }
 0x345   : > { %p1696_p3 = scmp.ne.s32.totalorder %s1689_s29, 0  ;;  %s864_s7 = scalar_lea.sflag [#allocation4], %s863_s26 }
 0x347   : > { %p1225_p4 = pnand %p1230_p2, %p1696_p3 }
 0x349   : > { %1364 = dma.done.wait (!%p1225_p4), %s864_s7, 16  }
 0x34a   : > { %1366 = vsyncadd (!%p1225_p4), %s864_s7, 4294967280  ;;  %p16_p7 = scmp.ge.s32.totalorder %s1449_s24, 4   ;;  %s1697_s18 = smov %s1373_s19 }
 0x34b   : > { %s1698_s19 = smov %s1377_s20  ;;  %s1699_s20 = smov %s1460_s27 }
 0x34c   : > { %s1700_s21 = smov %s1449_s24  ;;  %18 = sbr.rel (!%p16_p7) target bundleno = 4 (0x4), region = 86 }
 0x353   :  { %868 = vsyncpa [#allocation3], 1 }
 0x354   :  { %870 = vsyncpa [#allocation3 + $0x1], 1 }
 0x355   :  { %871 = vsyncpa [#allocation4], 1 }
 0x356   :  { %873 = vsyncpa [#allocation4 + $0x1], 1 }

</bundles_post_ra>
